<compile_context>
chip_gen: v7x
topology: tpu7x:2x2x1
jax: 0.10.0
libtpu: 0.0.40
codegen_flags: <defaults>
</compile_context>

<pallas_src>
import functools

import jax
import jax.numpy as jnp
from jax.experimental import pallas as pl
from jax.experimental.pallas import tpu as pltpu


def _lane_pad(n):
    return ((n + 127) // 128) * 128


def _round_up(n, m):
    return ((n + m - 1) // m) * m


def _bi_interaction_kernel(x_ref, o_ref, *, num_fields, embed_dim):
    """x_ref: (TB, F*E) tile; o_ref: (TB, E) tile.

    Statically-unrolled per-field accumulation: live values are ~3 (TB, E)
    f32 arrays (xf, s, q); VPU adds/muls only, fully hidden under the
    streaming input DMA.
    """
    tb = o_ref.shape[0]
    s = jnp.zeros((tb, embed_dim), jnp.float32)
    q = jnp.zeros((tb, embed_dim), jnp.float32)
    for f in range(num_fields):  # F is small; unrolled at trace time
        xf = x_ref[:, f * embed_dim:(f + 1) * embed_dim].astype(jnp.float32)
        s = s + xf
        q = q + xf * xf
    o_ref[...] = (0.5 * (s * s - q)).astype(o_ref.dtype)


def _choose_block_b(B, pack, bytes_per_row, budget, block_b):
    if block_b is not None:
        tb = min(int(block_b), B)
    else:
        tb = budget // max(bytes_per_row, 1)
        # Keep >=2 (prefer >=4) grid steps so both v7x TensorCores get work
        # and prefetch/compute overlap exists, without shrinking below one
        # packed tile.
        if B >= 4 * pack:
            tb = min(tb, pl.cdiv(B, 4))
        elif B >= 2 * pack:
            tb = min(tb, pl.cdiv(B, 2))
        tb = min(tb, B, 4096)
    if tb >= B:
        return B                              # full-dim block: always legal
    tb = max(pack, (tb // pack) * pack)       # dtype sublane packing
    return min(tb, B)


def bi_interaction_pooling(x, *, block_b=None,
                           vmem_tile_budget_bytes=16 * 1024 * 1024):
    """x: (B, F, E) -> (B, 1, E), same dtype as x."""
    B, F, E = x.shape
    dsize = jnp.dtype(x.dtype).itemsize
    # Sublane packing of the second-minor block dim for this dtype.
    pack = {4: 8, 2: 16, 1: 32}.get(dsize, 8)

    # Lane-dense, contiguous presentation of the input (free reshape).
    FE = F * E
    x2d = x.reshape(B, FE)

    # Padded-VMEM accounting per batch row: double-buffered input + output
    # tiles plus ~3 live (TB, E) f32 accumulators inside the body.
    in_row = _lane_pad(FE) * dsize
    out_row = _lane_pad(E) * dsize
    acc_row = 3 * _lane_pad(E) * 4
    bytes_per_row = 2 * (in_row + out_row) + acc_row

    tb = _choose_block_b(B, pack, bytes_per_row, vmem_tile_budget_bytes,
                         block_b)
    grid_b = pl.cdiv(B, tb)

    # Scoped-VMEM limit from the actual padded footprint (+25% headroom),
    # clamped to what every generation can grant (v7x: 64 MiB/TC physical).
    footprint = tb * bytes_per_row
    vmem_limit = int(min(max(32 * 1024 * 1024, footprint * 5 // 4),
                         64 * 1024 * 1024))

    cost = pl.CostEstimate(
        flops=3 * B * F * E + 3 * B * E,
        transcendentals=0,
        bytes_accessed=(B * F * E + B * E) * dsize,
    )

    kernel = functools.partial(_bi_interaction_kernel,
                               num_fields=F, embed_dim=E)

    out2d = pl.pallas_call(
        kernel,
        out_shape=jax.ShapeDtypeStruct((B, E), x.dtype),
        grid_spec=pltpu.PrefetchScalarGridSpec(
            num_scalar_prefetch=0,
            grid=(grid_b,),
            in_specs=[pl.BlockSpec((tb, FE), lambda b: (b, 0))],
            out_specs=pl.BlockSpec((tb, E), lambda b: (b, 0)),
        ),
        compiler_params=pltpu.CompilerParams(
            dimension_semantics=("parallel",),
            vmem_limit_bytes=vmem_limit,
        ),
        cost_estimate=cost,
    )(x2d)

    # keepdim=True restored with a free metadata reshape.
    return out2d.reshape(B, 1, E)


def bi_interaction_pooling_ref(x):
    xf = x.astype(jnp.float32)
    s = jnp.sum(xf, axis=1, keepdims=True)
    sq = jnp.sum(xf * xf, axis=1, keepdims=True)
    return (0.5 * (s * s - sq)).astype(x.dtype)


if __name__ == "__main__":
    key = jax.random.PRNGKey(0)
    k0, k1, k2, k3 = jax.random.split(key, 4)

    # 1) Small shape matching the module's (batch, field, embed) convention.
    B, F, E = 2, 4, 32
    x = jax.random.normal(k0, (B, F, E), dtype=jnp.float32)
    out = jax.block_until_ready(bi_interaction_pooling(x))
    ref = bi_interaction_pooling_ref(x)
    assert out.shape == (B, 1, E), out.shape
    assert out.dtype == x.dtype, out.dtype
    assert jnp.allclose(out, ref, atol=1e-5, rtol=1e-5), "f32 mismatch"

    # 2) Multi-block batched path (explicit block size, 3 grid steps).
    B2, F2, E2 = 48, 8, 32
    x2 = jax.random.normal(k1, (B2, F2, E2), dtype=jnp.float32)
    out2 = jax.block_until_ready(bi_interaction_pooling(x2, block_b=16))
    ref2 = bi_interaction_pooling_ref(x2)
    assert out2.shape == (B2, 1, E2), out2.shape
    assert jnp.allclose(out2, ref2, atol=1e-5, rtol=1e-5), "multi-block mismatch"

    # 3) bf16 input: f32 accumulation in-kernel, cast only at the store.
    B3, F3, E3 = 16, 4, 64
    x3 = jax.random.normal(k2, (B3, F3, E3), dtype=jnp.bfloat16)
    out3 = jax.block_until_ready(bi_interaction_pooling(x3))
    ref3 = bi_interaction_pooling_ref(x3)
    assert out3.shape == (B3, 1, E3), out3.shape
    assert out3.dtype == jnp.bfloat16, out3.dtype
    assert jnp.allclose(out3.astype(jnp.float32), ref3.astype(jnp.float32),
                        atol=1e-2, rtol=1e-2), "bf16 mismatch"

    # 4) Auto-tiled path with a partial last block and non-128-multiple F*E.
    B4, F4, E4 = 100, 6, 48
    x4 = jax.random.normal(k3, (B4, F4, E4), dtype=jnp.float32)
    out4 = jax.block_until_ready(bi_interaction_pooling(x4))
    ref4 = bi_interaction_pooling_ref(x4)
    assert out4.shape == (B4, 1, E4), out4.shape
    assert jnp.allclose(out4, ref4, atol=1e-5, rtol=1e-5), "partial-block mismatch"

    print("KERNEL_OK")
</pallas_src>

<mosaic_0001>
module attributes {stable_mosaic.version = 11 : i64} {
  func.func @_bi_interaction_kernel(%arg0: i32, %arg1: memref<2x128xf32, #tpu.memory_space<vmem>>, %arg2: memref<2x32xf32, #tpu.memory_space<vmem>>) attributes {dimension_semantics = [#tpu.dimension_semantics<parallel>], iteration_bounds = array<i64: 1>, scalar_prefetch = 0 : i64, scratch_operands = 0 : i64, tpu.core_type = #tpu.core_type<tc>, window_params = [{transform_indices = @transform_0, window_bounds = array<i64: 2, 128>}, {transform_indices = @transform_1, window_bounds = array<i64: 2, 32>}]} {
    %cst = arith.constant 0.000000e+00 : f32
    %0 = vector.broadcast %cst : f32 to vector<2x32xf32>
    %cst_0 = arith.constant 0.000000e+00 : f32
    %1 = vector.broadcast %cst_0 : f32 to vector<2x32xf32>
    %c0 = arith.constant 0 : index
    %c0_1 = arith.constant 0 : index
    %2 = vector.load %arg1[%c0, %c0_1] : memref<2x128xf32, #tpu.memory_space<vmem>>, vector<2x32xf32>
    %3 = arith.addf %0, %2 : vector<2x32xf32>
    %4 = arith.mulf %2, %2 : vector<2x32xf32>
    %5 = arith.addf %1, %4 : vector<2x32xf32>
    %c0_2 = arith.constant 0 : index
    %c32 = arith.constant 32 : index
    %6 = vector.load %arg1[%c0_2, %c32] : memref<2x128xf32, #tpu.memory_space<vmem>>, vector<2x32xf32>
    %7 = arith.addf %3, %6 : vector<2x32xf32>
    %8 = arith.mulf %6, %6 : vector<2x32xf32>
    %9 = arith.addf %5, %8 : vector<2x32xf32>
    %c0_3 = arith.constant 0 : index
    %c64 = arith.constant 64 : index
    %10 = vector.load %arg1[%c0_3, %c64] : memref<2x128xf32, #tpu.memory_space<vmem>>, vector<2x32xf32>
    %11 = arith.addf %7, %10 : vector<2x32xf32>
    %12 = arith.mulf %10, %10 : vector<2x32xf32>
    %13 = arith.addf %9, %12 : vector<2x32xf32>
    %c0_4 = arith.constant 0 : index
    %c96 = arith.constant 96 : index
    %14 = vector.load %arg1[%c0_4, %c96] : memref<2x128xf32, #tpu.memory_space<vmem>>, vector<2x32xf32>
    %15 = arith.addf %11, %14 : vector<2x32xf32>
    %16 = arith.mulf %14, %14 : vector<2x32xf32>
    %17 = arith.addf %13, %16 : vector<2x32xf32>
    %18 = arith.mulf %15, %15 : vector<2x32xf32>
    %19 = arith.subf %18, %17 : vector<2x32xf32>
    %cst_5 = arith.constant 5.000000e-01 : f32
    %20 = vector.broadcast %cst_5 : f32 to vector<2x32xf32>
    %21 = arith.mulf %20, %19 : vector<2x32xf32>
    %c0_6 = arith.constant 0 : index
    %c0_7 = arith.constant 0 : index
    %22 = vector.load %arg2[%c0_6, %c0_7] : memref<2x32xf32, #tpu.memory_space<vmem>>, vector<2x32xf32>
    tpu.vector_store %arg2[%c0_6, %c0_7], %21 {strides = array<i32>} : memref<2x32xf32, #tpu.memory_space<vmem>>, vector<2x32xf32>,
    return
  }
  func.func @transform_0(%arg0: i32) -> (i32, i32) {
    %c0_i32 = arith.constant 0 : i32
    %c0_i32_0 = arith.constant 0 : i32
    return %arg0, %c0_i32 : i32, i32
  }
  func.func @transform_1(%arg0: i32) -> (i32, i32) {
    %c0_i32 = arith.constant 0 : i32
    %c0_i32_0 = arith.constant 0 : i32
    return %arg0, %c0_i32 : i32, i32
  }
}

</mosaic_0001>

<bundles_post_ra>
// kernel: tpu_custom_call.1
= control target key start
LH: loop header
LB: loop body
LE: loop exit
PB: predicated region body
PF: predicated region fallthrough
CT: control target
= control target key end

     0   :  { %6 = vsyncpa [#allocation3], 0  ;;  %s163_s0 = inlined_call_operand.hbm [shape: f32[2,128], index: 0, kind: input, shape index: {}]   ;;  %s164_s1 = inlined_call_operand.hbm [shape: f32[2,32], index: 1, kind: output, shape index: {}]  }
   0x1   :  { %7 = vsyncpa [#allocation4], 0  ;;  %s124_s6 = smov [#allocation2]   ;;  %s76_s10 = scalar_lea.hbm %s163_s0, 32 }
   0x2   :  { %s14_s7 = sshll.u32 %s124_s6, 4  ;;  %p77_p0 = scmp.ne.s32.totalorder %s163_s0, %s76_s10  ;;  %s15_s7 = int_to_ptr.vmem [resolvable:$true] %s14_s7 }
   0x3   :  { %p80_p1 = scmp.lt.u32.totalorder %s76_s10, %s163_s0 }
   0x5   :  { %p82_p2 = pnand %p80_p1, %p77_p0 }
   0x7   :  { %85 = shalt.err (!%p82_p2)
}
   0x8   :  { %s86_s15 = scalar_lea.vmem %s15_s7, 32  ;;  %p91_p4 = scmp.lt.s32.totalorder %s15_s7, %s15_s7 }
   0x9   :  { %p87_p3 = scmp.ne.s32.totalorder %s15_s7, %s86_s15  ;;  %p92_p5 = scmp.lt.s32.totalorder %s86_s15, %s86_s15 }
   0xb   :  { %p93_p6 = por %p92_p5, %p91_p4 }
   0xd   :  { %p94_p7 = pnand %p93_p6, %p87_p3 }
   0xf   :  { %97 = shalt.err (!%p94_p7)
}
  0x10   :  { %17 = dma.hbm_to_vmem [thread:$0]  %s163_s0, 32, %s15_s7, [#allocation3]  }
  0x11   :  { %120 = dma.done.wait [#allocation3], 32  }
  0x12   :  { %121 = vsyncadd [#allocation3], 4294967264  ;;  %v21_v0 = vld [vmem:[#allocation2] sm:$0x3]  ;;  %s125_s18 = smov 64   ;;  %s126_s19 = smov 96  }
  0x13   :  { %35 = vrot.lane.b32.xlu1 %v21_v0, %s125_s18  ;;  %26 = vrot.lane.b32.xlu0 %v21_v0, %s126_s19  ;;  %v23_v1 = vmul.f32 %v21_v0, %v21_v0  ;;  %s127_s20 = smov 32   ;;  %s128_s0 = smov [#allocation5]   ;;  %vm54_vm0 = vcmask 254976  }
  0x14   :  { %s62_s21 = sshll.u32 %s128_s0, 4  ;;  %s63_s21 = int_to_ptr.vmem [resolvable:$true] %s62_s21 }
  0x15   :  { %s98_s22 = scalar_lea.vmem %s63_s21, 32  ;;  %p103_p9 = scmp.lt.s32.totalorder %s63_s21, %s63_s21 }
  0x16   :  { %p99_p8 = scmp.ne.s32.totalorder %s63_s21, %s98_s22  ;;  %p104_p10 = scmp.lt.s32.totalorder %s98_s22, %s98_s22 }
  0x17   :  { %39 = vrot.lane.b32.xlu1 %v23_v1, %s125_s18  ;;  %31 = vrot.lane.b32.xlu0 %v23_v1, %s126_s19 }
  0x18   :  { %p105_p11 = por %p104_p10, %p103_p9 }
  0x1a   :  { %p106_p12 = pnand %p105_p11, %p99_p8 }
  0x1b   :  { %47 = vrot.lane.b32.xlu1 %v23_v1, %s127_s20  ;;  %43 = vrot.lane.b32.xlu0 %v21_v0, %s127_s20 }
  0x85   :  { %v36_v2 = vpop.permute.xlu1 %35  ;;  %v27_v3 = vpop.permute.xlu0 %26 }
  0x86   :  { %v29_v4 = vadd.f32 %v27_v3, %v21_v0 }
  0x88   :  { %v38_v9 = vadd.f32 %v36_v2, %v29_v4 }
  0x89   :  { %v40_v5 = vpop.permute.xlu1 %39  ;;  %v32_v6 = vpop.permute.xlu0 %31 }
  0x8a   :  { %v34_v7 = vadd.f32 %v32_v6, %v23_v1 }
  0x8c   :  { %v42_v8 = vadd.f32 %v40_v5, %v34_v7 }
  0x8d   :  { %v48_v10 = vpop.permute.xlu1 %47  ;;  %v44_v11 = vpop.permute.xlu0 %43 }
  0x8e   :  { %v46_v12 = vadd.f32 %v44_v11, %v38_v9  ;;  %v50_v13 = vadd.f32 %v48_v10, %v42_v8 }
  0x90   :  { %v51_v14 = vmul.f32 %v46_v12, %v46_v12 }
  0x92   :  { %v52_v15 = vsub.f32 %v51_v14, %v50_v13 }
  0x94   :  { %v53_v16 = vmul.f32 0.5, %v52_v15 }
  0x96   :  { %55 = vst.msk [vmem:[#allocation5] sm:$0x3] %vm54_vm0, %v53_v16 }
  0x97   :  { %109 = shalt.err (!%p106_p12)
}
  0x98   :  { %s110_s25 = scalar_lea.hbm %s164_s1, 32 }
  0x99   :  { %p111_p13 = scmp.ne.s32.totalorder %s164_s1, %s110_s25  ;;  %p114_p0 = scmp.lt.u32.totalorder %s110_s25, %s164_s1 }
  0x9b   :  { %p116_p1 = pnand %p114_p0, %p111_p13 }
  0x9d   :  { %119 = shalt.err (!%p116_p1)
}
  0x9e   :  { %65 = dma.vmem_to_hbm [thread:$0]  %s63_s21, 32, %s164_s1, [#allocation4]  }
  0x9f   :  { %122 = dma.done.wait [#allocation4], 32  }
  0xa0   :  { %123 = vsyncadd [#allocation4], 4294967264 }
  0xa1   :  { %69 = vsyncpa [#allocation3], 1 }
  0xa2   :  { %70 = vsyncpa [#allocation4], 1 }

</bundles_post_ra>
